<compile_context>
chip_gen: v7x
topology: tpu7x:2x2x1
jax: 0.10.0
libtpu: 0.0.40
codegen_flags: <defaults>
</compile_context>

<pallas_src>
import jax
import jax.numpy as jnp
from jax.experimental import pallas as pl
from jax.experimental.pallas import tpu as pltpu

ALPHA = 0.8
BETA = 0.2
GAMMA = 2.0          # focal exponent (focal branch weighted by 0.0 in the module)
EPSILON = 1e-07


def _round_up(x, m):
    return (x + m - 1) // m * m


def _round_down(x, m):
    return (x // m) * m


def _cdiv(a, b):
    return (a + b - 1) // b


def _make_kernel(tile_hw, inner_per, n_split, need_tail_mask, tail_valid):
    """Streaming Tversky partial-sum kernel for one (g, inner) grid cell.

    g indexes (batch n, hw-split s): n = g // n_split, s = g % n_split.
    Refs per step:
      act_ref, ann_ref        : (C, tile_hw)  logits / annotations tile
      tp_out, ann_out, p_out  : (C, 1)        per-(n, split) partial sums
      tp_acc, ann_acc, p_acc  : (C, 1) f32    running sums across the inner axis
    """

    def kernel(act_ref, ann_ref, tp_out, ann_out, p_out,
               tp_acc, ann_acc, p_acc):
        g = pl.program_id(0)
        i = pl.program_id(1)

        @pl.when(i == 0)
        def _init():
            tp_acc[...] = jnp.zeros_like(tp_acc)
            ann_acc[...] = jnp.zeros_like(ann_acc)
            p_acc[...] = jnp.zeros_like(p_acc)

        act = act_ref[...].astype(jnp.float32)          # (C, tile_hw)
        ann = ann_ref[...].astype(jnp.float32)

        # numerically-stable softmax over the channel (sublane) axis
        m = jnp.max(act, axis=0, keepdims=True)         # (1, tile_hw)
        e = jnp.exp(act - m)
        denom = jnp.sum(e, axis=0, keepdims=True)
        r = pl.reciprocal(denom, approx=True)
        r = r * (2.0 - denom * r)                       # one Newton step (~f32)
        probs = jnp.clip(e * r, EPSILON, 1.0 - EPSILON)

        def accumulate(p, a):
            tp_acc[...] += jnp.sum(p * a, axis=1, keepdims=True)
            ann_acc[...] += jnp.sum(a, axis=1, keepdims=True)
            p_acc[...] += jnp.sum(p, axis=1, keepdims=True)

        if need_tail_mask:
            # Only the globally-last HW tile is partial; mask probs AND ann
            # there so stale/garbage lanes never reach the accumulators.
            is_tail = i == inner_per - 1
            if n_split > 1:
                is_tail = jnp.logical_and(is_tail, g % n_split == n_split - 1)

            @pl.when(jnp.logical_not(is_tail))
            def _steady():
                accumulate(probs, ann)

            @pl.when(is_tail)
            def _tail():
                col = jax.lax.broadcasted_iota(jnp.int32, (1, tile_hw), 1)
                valid = col < tail_valid
                accumulate(jnp.where(valid, probs, 0.0),
                           jnp.where(valid, ann, 0.0))
        else:
            accumulate(probs, ann)

        @pl.when(i == inner_per - 1)
        def _finalize():
            tp_out[...] = tp_acc[...]
            ann_out[...] = ann_acc[...]
            p_out[...] = p_acc[...]

    return kernel


def _pick_hw_split(num_hw_tiles, n_batch):
    """Extra 'parallel' grid cells along HW so small-N shapes still keep both
    v7x TensorCores busy.  Must evenly divide the HW tile count."""
    if num_hw_tiles <= 1 or n_batch >= 4:
        return 1
    target = min(num_hw_tiles, _cdiv(4, n_batch))
    for cand in range(target, 1, -1):
        if num_hw_tiles % cand == 0:
            return cand
    return 1


def make_tversky_focal_loss(weight, *, max_tile_hw=2048,
                            cast_activations_to_bf16=False):
    """Mirrors the nn.Module: normalize class weights once (like __init__) and
    return a jitted forward(activations, annotations) -> scalar loss."""
    if weight is None:
        w_norm = None
    else:
        w = jnp.asarray(weight, dtype=jnp.float32)
        w_norm = w / jnp.sum(w)                         # hoisted out of forward
    max_tile_hw = max(128, _round_down(int(max_tile_hw), 128))

    def forward(activations, annotations):
        N, C, H, W = activations.shape
        HW = H * W

        act = activations.reshape(N, C, HW)             # metadata-only reshape
        ann = annotations.reshape(N, C, HW)
        # Narrow dtypes stream straight through (upcast to f32 in-kernel, like
        # the module's .float()); anything else is cast to f32 in the wrapper.
        if act.dtype.name not in ("float32", "bfloat16"):
            act = act.astype(jnp.float32)
        if ann.dtype.name not in ("float32", "bfloat16"):
            ann = ann.astype(jnp.float32)
        if cast_activations_to_bf16:
            # Optional v5e HBM saver; off by default to keep exact f32 logits.
            act = act.astype(jnp.bfloat16)

        # Lane tile: multiple of 128, capped so double-buffered inputs stay in
        # a small slice of scoped VMEM on every TPU generation.
        vmem_input_budget = 8 * 1024 * 1024
        bytes_per_col = 2 * C * (act.dtype.itemsize + ann.dtype.itemsize)
        tile_cap = _round_down(max(vmem_input_budget // bytes_per_col, 128), 128)
        tile_cap = max(128, min(max_tile_hw, tile_cap))

        if _round_up(HW, 128) <= tile_cap:
            tile_hw = HW                                 # single full-extent tile
            num_hw = 1
        else:
            tile_hw = tile_cap
            num_hw = _cdiv(HW, tile_hw)

        n_split = _pick_hw_split(num_hw, N)
        inner_per = num_hw // n_split
        G = N * n_split
        need_tail_mask = (HW % tile_hw) != 0
        tail_valid = HW - (num_hw - 1) * tile_hw

        if n_split == 1:
            def in_map(g, i):
                return (g, 0, i)
        else:
            def in_map(g, i):
                return (g // n_split, 0, (g % n_split) * inner_per + i)

        def out_map(g, i):
            return (g, 0, 0)

        kernel = _make_kernel(tile_hw, inner_per, n_split,
                              need_tail_mask, tail_valid)
        part_shape = jax.ShapeDtypeStruct((G, C, 1), jnp.float32)

        tp, ann_sum, p_sum = pl.pallas_call(
            kernel,
            out_shape=(part_shape, part_shape, part_shape),
            grid_spec=pltpu.PrefetchScalarGridSpec(
                num_scalar_prefetch=0,
                grid=(G, inner_per),
                in_specs=[
                    pl.BlockSpec((None, C, tile_hw), in_map),
                    pl.BlockSpec((None, C, tile_hw), in_map),
                ],
                out_specs=[
                    pl.BlockSpec((None, C, 1), out_map),
                    pl.BlockSpec((None, C, 1), out_map),
                    pl.BlockSpec((None, C, 1), out_map),
                ],
                scratch_shapes=[
                    pltpu.VMEM((C, 1), jnp.float32),     # sum(p * ann)
                    pltpu.VMEM((C, 1), jnp.float32),     # sum(ann)
                    pltpu.VMEM((C, 1), jnp.float32),     # sum(p)
                ],
            ),
            compiler_params=pltpu.CompilerParams(
                dimension_semantics=("parallel", "arbitrary")),
        )(act, ann)

        def combine(x):                                   # (G,C,1) -> (N,C)
            return jnp.sum(x.reshape(N, n_split, C), axis=1)

        tp = combine(tp)
        fn = combine(ann_sum) - tp        # == sum((1 - p) * ann)
        fp = combine(p_sum) - tp          # == sum(p * (1 - ann))
        ti = (tp + EPSILON) / (tp + ALPHA * fn + BETA * fp + EPSILON)
        t_loss = 1.0 - ti                 # (N, C)
        if w_norm is not None:
            t_loss = t_loss * w_norm.reshape(1, C)
        t_loss = jnp.mean(t_loss)
        # Module returns f_loss * 0.0 + t_loss * 1.0 == t_loss: the focal
        # branch is dead compute and intentionally not materialized.
        return t_loss

    return jax.jit(forward)


def _reference(activations, annotations, weight):
    """Pure-JAX port of the full PyTorch forward (incl. focal) for checking."""
    activations = activations.astype(jnp.float32)
    annotations = annotations.astype(jnp.float32)
    probs = jax.nn.softmax(activations, axis=1)
    probs = jnp.clip(probs, EPSILON, 1.0 - EPSILON)
    tp = jnp.sum(probs * annotations, axis=(2, 3))
    fn = jnp.sum((1.0 - probs) * annotations, axis=(2, 3))
    fp = jnp.sum(probs * (1.0 - annotations), axis=(2, 3))
    ti = (tp + EPSILON) / (tp + ALPHA * fn + BETA * fp + EPSILON)
    tl = 1.0 - ti
    pt = jnp.where(annotations > 0.0, probs, 1.0 - probs)
    fl = -jnp.power(1.0 - pt, GAMMA) * jnp.log(pt)
    if weight is not None:
        w = weight.astype(jnp.float32)
        w = w / jnp.sum(w)
        tl = tl * w.reshape(1, -1)
        fl = fl * w.reshape(1, -1, 1, 1)
    f_loss = jnp.mean(jnp.mean(fl, axis=(2, 3)))
    t_loss = jnp.mean(tl)
    return f_loss * 0.0 + t_loss * 1.0


if __name__ == "__main__":
    key = jax.random.PRNGKey(0)
    k1, k2, k3, k4 = jax.random.split(key, 4)

    # --- Test 1: module-scale shapes (single-tile fast path) -----------------
    N, C, H, W = 2, 4, 16, 16
    activations = jax.random.normal(k1, (N, C, H, W), dtype=jnp.float32)
    labels = jax.random.randint(k2, (N, H, W), 0, C)
    # one-hot built directly in bf16 (0/1 exact) -> halves annotation HBM traffic
    annotations = jax.nn.one_hot(labels, C, axis=1).astype(jnp.bfloat16)
    weight = jnp.arange(1, C + 1, dtype=jnp.float32)

    loss_fn = make_tversky_focal_loss(weight)
    out = jax.block_until_ready(loss_fn(activations, annotations))
    ref = _reference(activations, annotations, weight)
    assert jnp.allclose(out, ref, rtol=1e-4, atol=1e-6), (out, ref)

    # --- Test 2: multi-tile path (HW tail mask + HW split parallelism) -------
    N2, C2, H2, W2 = 1, 3, 40, 37
    activations2 = jax.random.normal(k3, (N2, C2, H2, W2), dtype=jnp.float32)
    labels2 = jax.random.randint(k4, (N2, H2, W2), 0, C2)
    annotations2 = jax.nn.one_hot(labels2, C2, axis=1).astype(jnp.bfloat16)
    weight2 = jnp.array([0.2, 0.5, 0.3], dtype=jnp.float32)

    loss_fn2 = make_tversky_focal_loss(weight2, max_tile_hw=256)
    out2 = jax.block_until_ready(loss_fn2(activations2, annotations2))
    ref2 = _reference(activations2, annotations2, weight2)
    assert jnp.allclose(out2, ref2, rtol=1e-4, atol=1e-6), (out2, ref2)

    print("KERNEL_OK")
</pallas_src>

<mosaic_0001>
module attributes {stable_mosaic.version = 11 : i64} {
  func.func @kernel(%arg0: i32, %arg1: i32, %arg2: memref<1x4x256xf32, #tpu.memory_space<vmem>>, %arg3: memref<1x4x256xbf16, #tpu.memory_space<vmem>>, %arg4: memref<1x4x1xf32, #tpu.memory_space<vmem>>, %arg5: memref<1x4x1xf32, #tpu.memory_space<vmem>>, %arg6: memref<1x4x1xf32, #tpu.memory_space<vmem>>, %arg7: memref<4x1xf32, #tpu.memory_space<vmem>>, %arg8: memref<4x1xf32, #tpu.memory_space<vmem>>, %arg9: memref<4x1xf32, #tpu.memory_space<vmem>>) attributes {dimension_semantics = [#tpu.dimension_semantics<parallel>, #tpu.dimension_semantics<arbitrary>], iteration_bounds = array<i64: 2, 1>, scalar_prefetch = 0 : i64, scratch_operands = 3 : i64, tpu.core_type = #tpu.core_type<tc>, window_params = [{transform_indices = @transform_0, window_bounds = array<i64: 1, 4, 256>}, {transform_indices = @transform_1, window_bounds = array<i64: 1, 4, 256>}, {transform_indices = @transform_2, window_bounds = array<i64: 1, 4, 1>}, {transform_indices = @transform_3, window_bounds = array<i64: 1, 4, 1>}, {transform_indices = @transform_4, window_bounds = array<i64: 1, 4, 1>}]} {
    %c0_i32 = arith.constant 0 : i32
    %0 = arith.cmpi eq, %arg1, %c0_i32 : i32
    %1 = arith.extui %0 : i1 to i32
    %c0_i32_0 = arith.constant 0 : i32
    %2 = arith.cmpi ne, %1, %c0_i32_0 : i32
    scf.if %2 {
      %cst_27 = arith.constant 0.000000e+00 : f32
      %45 = vector.broadcast %cst_27 : f32 to vector<4x1xf32>
      %c0_28 = arith.constant 0 : index
      %c0_29 = arith.constant 0 : index
      %46 = vector.load %arg7[%c0_28, %c0_29] : memref<4x1xf32, #tpu.memory_space<vmem>>, vector<4x1xf32>
      tpu.vector_store %arg7[%c0_28, %c0_29], %45 {strides = array<i32>} : memref<4x1xf32, #tpu.memory_space<vmem>>, vector<4x1xf32>,
      %cst_30 = arith.constant 0.000000e+00 : f32
      %47 = vector.broadcast %cst_30 : f32 to vector<4x1xf32>
      %c0_31 = arith.constant 0 : index
      %c0_32 = arith.constant 0 : index
      %48 = vector.load %arg8[%c0_31, %c0_32] : memref<4x1xf32, #tpu.memory_space<vmem>>, vector<4x1xf32>
      tpu.vector_store %arg8[%c0_31, %c0_32], %47 {strides = array<i32>} : memref<4x1xf32, #tpu.memory_space<vmem>>, vector<4x1xf32>,
      %cst_33 = arith.constant 0.000000e+00 : f32
      %49 = vector.broadcast %cst_33 : f32 to vector<4x1xf32>
      %c0_34 = arith.constant 0 : index
      %c0_35 = arith.constant 0 : index
      %50 = vector.load %arg9[%c0_34, %c0_35] : memref<4x1xf32, #tpu.memory_space<vmem>>, vector<4x1xf32>
      tpu.vector_store %arg9[%c0_34, %c0_35], %49 {strides = array<i32>} : memref<4x1xf32, #tpu.memory_space<vmem>>, vector<4x1xf32>,
    } else {
    }
    %c0 = arith.constant 0 : index
    %c0_1 = arith.constant 0 : index
    %c0_2 = arith.constant 0 : index
    %3 = vector.load %arg2[%c0, %c0_1, %c0_2] : memref<1x4x256xf32, #tpu.memory_space<vmem>>, vector<1x4x256xf32>
    %4 = vector.shape_cast %3 : vector<1x4x256xf32> to vector<4x256xf32>
    %c0_3 = arith.constant 0 : index
    %c0_4 = arith.constant 0 : index
    %c0_5 = arith.constant 0 : index
    %5 = vector.load %arg3[%c0_3, %c0_4, %c0_5] : memref<1x4x256xbf16, #tpu.memory_space<vmem>>, vector<1x4x256xbf16>
    %6 = vector.shape_cast %5 : vector<1x4x256xbf16> to vector<4x256xbf16>
    %7 = arith.extf %6 : vector<4x256xbf16> to vector<4x256xf32>
    %cst = arith.constant dense<0xFF800000> : vector<256xf32>
    %8 = vector.multi_reduction <maximumf>, %4, %cst [0] : vector<4x256xf32> to vector<256xf32>
    %9 = vector.shape_cast %8 : vector<256xf32> to vector<1x256xf32>
    %10 = vector.broadcast %9 : vector<1x256xf32> to vector<4x256xf32>
    %11 = arith.subf %4, %10 : vector<4x256xf32>
    %12 = math.exp %11 : vector<4x256xf32>
    %cst_6 = arith.constant dense<0.000000e+00> : vector<256xf32>
    %13 = vector.multi_reduction <add>, %12, %cst_6 [0] : vector<4x256xf32> to vector<256xf32>
    %14 = vector.shape_cast %13 : vector<256xf32> to vector<1x256xf32>
    %15 = tpu.reciprocal %14 {approx = true} : vector<1x256xf32> -> vector<1x256xf32>
    %16 = arith.mulf %14, %15 : vector<1x256xf32>
    %cst_7 = arith.constant 2.000000e+00 : f32
    %17 = vector.broadcast %cst_7 : f32 to vector<1x256xf32>
    %18 = arith.subf %17, %16 : vector<1x256xf32>
    %19 = arith.mulf %15, %18 : vector<1x256xf32>
    %20 = vector.broadcast %19 : vector<1x256xf32> to vector<4x256xf32>
    %21 = arith.mulf %12, %20 : vector<4x256xf32>
    %cst_8 = arith.constant 1.000000e-07 : f32
    %cst_9 = arith.constant 0.99999988 : f32
    %22 = vector.broadcast %cst_8 : f32 to vector<4x256xf32>
    %23 = arith.maximumf %22, %21 : vector<4x256xf32>
    %24 = vector.broadcast %cst_9 : f32 to vector<4x256xf32>
    %25 = arith.minimumf %24, %23 : vector<4x256xf32>
    %c0_10 = arith.constant 0 : index
    %c0_11 = arith.constant 0 : index
    %26 = vector.load %arg7[%c0_10, %c0_11] : memref<4x1xf32, #tpu.memory_space<vmem>>, vector<4x1xf32>
    %27 = arith.mulf %25, %7 : vector<4x256xf32>
    %cst_12 = arith.constant dense<0.000000e+00> : vector<4xf32>
    %28 = vector.multi_reduction <add>, %27, %cst_12 [1] : vector<4x256xf32> to vector<4xf32>
    %29 = vector.shape_cast %28 : vector<4xf32> to vector<4x1xf32>
    %30 = arith.addf %26, %29 : vector<4x1xf32>
    %c0_13 = arith.constant 0 : index
    %c0_14 = arith.constant 0 : index
    %31 = vector.load %arg7[%c0_13, %c0_14] : memref<4x1xf32, #tpu.memory_space<vmem>>, vector<4x1xf32>
    tpu.vector_store %arg7[%c0_13, %c0_14], %30 {strides = array<i32>} : memref<4x1xf32, #tpu.memory_space<vmem>>, vector<4x1xf32>,
    %c0_15 = arith.constant 0 : index
    %c0_16 = arith.constant 0 : index
    %32 = vector.load %arg8[%c0_15, %c0_16] : memref<4x1xf32, #tpu.memory_space<vmem>>, vector<4x1xf32>
    %cst_17 = arith.constant dense<0.000000e+00> : vector<4xf32>
    %33 = vector.multi_reduction <add>, %7, %cst_17 [1] : vector<4x256xf32> to vector<4xf32>
    %34 = vector.shape_cast %33 : vector<4xf32> to vector<4x1xf32>
    %35 = arith.addf %32, %34 : vector<4x1xf32>
    %c0_18 = arith.constant 0 : index
    %c0_19 = arith.constant 0 : index
    %36 = vector.load %arg8[%c0_18, %c0_19] : memref<4x1xf32, #tpu.memory_space<vmem>>, vector<4x1xf32>
    tpu.vector_store %arg8[%c0_18, %c0_19], %35 {strides = array<i32>} : memref<4x1xf32, #tpu.memory_space<vmem>>, vector<4x1xf32>,
    %c0_20 = arith.constant 0 : index
    %c0_21 = arith.constant 0 : index
    %37 = vector.load %arg9[%c0_20, %c0_21] : memref<4x1xf32, #tpu.memory_space<vmem>>, vector<4x1xf32>
    %cst_22 = arith.constant dense<0.000000e+00> : vector<4xf32>
    %38 = vector.multi_reduction <add>, %25, %cst_22 [1] : vector<4x256xf32> to vector<4xf32>
    %39 = vector.shape_cast %38 : vector<4xf32> to vector<4x1xf32>
    %40 = arith.addf %37, %39 : vector<4x1xf32>
    %c0_23 = arith.constant 0 : index
    %c0_24 = arith.constant 0 : index
    %41 = vector.load %arg9[%c0_23, %c0_24] : memref<4x1xf32, #tpu.memory_space<vmem>>, vector<4x1xf32>
    tpu.vector_store %arg9[%c0_23, %c0_24], %40 {strides = array<i32>} : memref<4x1xf32, #tpu.memory_space<vmem>>, vector<4x1xf32>,
    %c0_i32_25 = arith.constant 0 : i32
    %42 = arith.cmpi eq, %arg1, %c0_i32_25 : i32
    %43 = arith.extui %42 : i1 to i32
    %c0_i32_26 = arith.constant 0 : i32
    %44 = arith.cmpi ne, %43, %c0_i32_26 : i32
    scf.if %44 {
      %c0_27 = arith.constant 0 : index
      %c0_28 = arith.constant 0 : index
      %45 = vector.load %arg7[%c0_27, %c0_28] : memref<4x1xf32, #tpu.memory_space<vmem>>, vector<4x1xf32>
      %c0_29 = arith.constant 0 : index
      %c0_30 = arith.constant 0 : index
      %c0_31 = arith.constant 0 : index
      %46 = vector.load %arg4[%c0_29, %c0_30, %c0_31] : memref<1x4x1xf32, #tpu.memory_space<vmem>>, vector<1x4x1xf32>
      %47 = vector.shape_cast %46 : vector<1x4x1xf32> to vector<4x1xf32>
      %48 = vector.shape_cast %45 : vector<4x1xf32> to vector<1x4x1xf32>
      tpu.vector_store %arg4[%c0_29, %c0_30, %c0_31], %48 {strides = array<i32>} : memref<1x4x1xf32, #tpu.memory_space<vmem>>, vector<1x4x1xf32>,
      %c0_32 = arith.constant 0 : index
      %c0_33 = arith.constant 0 : index
      %49 = vector.load %arg8[%c0_32, %c0_33] : memref<4x1xf32, #tpu.memory_space<vmem>>, vector<4x1xf32>
      %c0_34 = arith.constant 0 : index
      %c0_35 = arith.constant 0 : index
      %c0_36 = arith.constant 0 : index
      %50 = vector.load %arg5[%c0_34, %c0_35, %c0_36] : memref<1x4x1xf32, #tpu.memory_space<vmem>>, vector<1x4x1xf32>
      %51 = vector.shape_cast %50 : vector<1x4x1xf32> to vector<4x1xf32>
      %52 = vector.shape_cast %49 : vector<4x1xf32> to vector<1x4x1xf32>
      tpu.vector_store %arg5[%c0_34, %c0_35, %c0_36], %52 {strides = array<i32>} : memref<1x4x1xf32, #tpu.memory_space<vmem>>, vector<1x4x1xf32>,
      %c0_37 = arith.constant 0 : index
      %c0_38 = arith.constant 0 : index
      %53 = vector.load %arg9[%c0_37, %c0_38] : memref<4x1xf32, #tpu.memory_space<vmem>>, vector<4x1xf32>
      %c0_39 = arith.constant 0 : index
      %c0_40 = arith.constant 0 : index
      %c0_41 = arith.constant 0 : index
      %54 = vector.load %arg6[%c0_39, %c0_40, %c0_41] : memref<1x4x1xf32, #tpu.memory_space<vmem>>, vector<1x4x1xf32>
      %55 = vector.shape_cast %54 : vector<1x4x1xf32> to vector<4x1xf32>
      %56 = vector.shape_cast %53 : vector<4x1xf32> to vector<1x4x1xf32>
      tpu.vector_store %arg6[%c0_39, %c0_40, %c0_41], %56 {strides = array<i32>} : memref<1x4x1xf32, #tpu.memory_space<vmem>>, vector<1x4x1xf32>,
    } else {
    }
    return
  }
  func.func @transform_0(%arg0: i32, %arg1: i32) -> (i32, i32, i32) {
    %c0_i32 = arith.constant 0 : i32
    %c0_i32_0 = arith.constant 0 : i32
    return %arg0, %c0_i32, %arg1 : i32, i32, i32
  }
  func.func @transform_1(%arg0: i32, %arg1: i32) -> (i32, i32, i32) {
    %c0_i32 = arith.constant 0 : i32
    %c0_i32_0 = arith.constant 0 : i32
    return %arg0, %c0_i32, %arg1 : i32, i32, i32
  }
  func.func @transform_2(%arg0: i32, %arg1: i32) -> (i32, i32, i32) {
    %c0_i32 = arith.constant 0 : i32
    %c0_i32_0 = arith.constant 0 : i32
    %c0_i32_1 = arith.constant 0 : i32
    return %arg0, %c0_i32, %c0_i32_0 : i32, i32, i32
  }
  func.func @transform_3(%arg0: i32, %arg1: i32) -> (i32, i32, i32) {
    %c0_i32 = arith.constant 0 : i32
    %c0_i32_0 = arith.constant 0 : i32
    %c0_i32_1 = arith.constant 0 : i32
    return %arg0, %c0_i32, %c0_i32_0 : i32, i32, i32
  }
  func.func @transform_4(%arg0: i32, %arg1: i32) -> (i32, i32, i32) {
    %c0_i32 = arith.constant 0 : i32
    %c0_i32_0 = arith.constant 0 : i32
    %c0_i32_1 = arith.constant 0 : i32
    return %arg0, %c0_i32, %c0_i32_0 : i32, i32, i32
  }
}

</mosaic_0001>

<bundles_post_ra>
// kernel: forward.1
= control target key start
LH: loop header
LB: loop body
LE: loop exit
PB: predicated region body
PF: predicated region fallthrough
CT: control target
= control target key end

     0   :  { %s638_s15 = smov 0   ;;  %s640_s16 = smov 0   ;;  %s709_s0 = inlined_call_operand.vmem [shape: f32[2,4,256], index: 0, kind: input, shape index: {}]   ;;  %s710_s1 = inlined_call_operand.vmem [shape: bf16[2,4,256], index: 1, kind: input, shape index: {}]   ;;  %s711_s2 = inlined_call_operand.vmem [shape: f32[2,4,1], index: 2, kind: output, shape index: {0}]   ;;  %s712_s3 = inlined_call_operand.vmem [shape: f32[2,4,1], index: 3, kind: output, shape index: {1}]   ;;  %s713_s4 = inlined_call_operand.vmem [shape: f32[2,4,1], index: 4, kind: output, shape index: {2}]  }
   0x1   :  { %s642_s17 = smov 0  }
   0x2 LB: > { %s27_s18 = sadd.s32 1, %s606_s16  ;;  %p544_p0 = scmp.ge.s32.totalorder %s610_s17, 1  ;;  %s610_s17 = sphi %s642_s17, %s15_s17   ;;  %s606_s16 = sphi %s640_s16, %s715_s16   ;;  %s602_s15 = sphi %s638_s15, %s714_s15  }
   0x3   : > { %p29_p1 = scmp.ge.s32.totalorder %s27_s18, 2  ;;  %p203_p2 = scmp.lt.s32.totalorder %s610_s17, 3 }
   0x5   : > { %s717_s18 = smov (%p29_p1, %s27_s18), 0  ;;  %p204_p3 = pnand %p544_p0, %p203_p2 }
   0x6   : > { %p250_p4 = scmp.lt.s32.totalorder (!%p204_p3), %s602_s15, 1  ;;  %vm285_vm0 = vcmask (!%p204_p3), 3072   ;;  %v612_v0 = vmov (!%p204_p3), 0.0   ;;  %vm295_vm1 = vcmask (!%p204_p3), 1043456  }
   0x7   : > { %207 = sbr.rel (%p204_p3) target bundleno = 254 (0xfe), region = 28  ;;  %286 = vst.msk [vmem:[#allocation2] sm:$0xf] (!%p204_p3), %vm285_vm0, %v612_v0  ;;  %287 = vst.msk [vmem:[#allocation3] sm:$0xf] (!%p204_p3), %vm285_vm0, %v612_v0 }
   0x8   : > { %288 = vst.msk [vmem:[#allocation4] sm:$0xf] (!%p204_p3), %vm285_vm0, %v612_v0 }
   0xe   : > { %s719_s15 = smov (!%p250_p4, %s602_s15), 1  ;;  %v349_v0 = vld [vmem:[#allocation2] sm:$0xf] }
   0xf   : > { %s554_s19 = sshll.u32 %s719_s15, 3  ;;  %s670_s23 = sshll.u32 %s719_s15, 2  ;;  %v373_v63 = vld [vmem:[#allocation4] sm:$0xf] }
  0x10   : > { %s257_s22 = scalar_lea.vmem %s709_s0, %s554_s19  ;;  %s267_s26 = scalar_lea.vmem %s710_s1, %s670_s23 }
  0x11   : > { %v289_v1 = vld [vmem:[%s257_s22] sm:$0xff]  ;;  %s280_s29 = scalar_lea.vmem %s713_s4, %s670_s23  ;;  %s272_s6 = scalar_lea.vmem %s711_s2, %s670_s23 }
  0x12   : > { %v293_v2 = vcombine.high %v289_v1, %v289_v1  ;;  %v296_v3 = vsel %vm295_vm1, %v289_v1, -inf  ;;  %v290_v45 = vld [vmem:[%s267_s26] sm:$0xf]  ;;  %s276_s9 = scalar_lea.vmem %s712_s3, %s670_s23 }
  0x13   : > { %v297_v4 = vrot.slane %v296_v3, 4  ;;  %v291_v47 = vunpack.c.l.bf16 %v290_v45 }
  0x14   : > { %v303_v5 = vsel %vm295_vm1, %v293_v2, -inf }
  0x15   : > { %v298_v6 = vmax.f32 %v296_v3, %v297_v4  ;;  %v304_v7 = vrot.slane %v303_v5, 4  ;;  %v364_v53 = vcombine.high %v291_v47, %v291_v47  ;;  %v366_v59 = vsel %vm295_vm1, %v291_v47, 0.0 }
  0x17   : > { %v299_v8 = vrot.slane %v298_v6, 2  ;;  %v305_v9 = vmax.f32 %v303_v5, %v304_v7  ;;  %v367_v60 = vsel %vm295_vm1, %v364_v53, 0.0  ;;  %v362_v5 = vld [vmem:[#allocation3] sm:$0xf] }
  0x18   : > { %v368_v62 = vadd.f32 %v367_v60, %v366_v59 }
  0x19   : > { %v300_v10 = vmax.f32 %v298_v6, %v299_v8  ;;  %v306_v11 = vrot.slane %v305_v9, 2 }
  0x1b   : > { %v301_v12 = vrot.slane %v300_v10, 1  ;;  %v307_v13 = vmax.f32 %v305_v9, %v306_v11 }
  0x1d   : > { %v302_v14 = vmax.f32 %v300_v10, %v301_v12  ;;  %v308_v15 = vrot.slane %v307_v13, 1 }
  0x1f   : > { %v309_v16 = vmax.f32 %v307_v13, %v308_v15 }
  0x21   : > { %v312_v17 = vcombine.low %v302_v14, %v309_v16 }
  0x23   : > { %v314_v18 = vsub.f32 %v289_v1, %v312_v17 }
  0x25   : > { %v315_v19 = vmul.f32 1.442695, %v314_v18 }
  0x27   : > { %582 = vpow2.f32 %v315_v19 }
  0x31   : > { %v583_v20 = vpop.eup %582 }
  0x32   : > { %v318_v21 = vcombine.high %v583_v20, %v583_v20  ;;  %v320_v22 = vsel %vm295_vm1, %v583_v20, 0.0 }
  0x33   : > { %v321_v23 = vrot.slane %v320_v22, 4 }
  0x34   : > { %v327_v24 = vsel %vm295_vm1, %v318_v21, 0.0 }
  0x35   : > { %v322_v25 = vadd.f32 %v321_v23, %v320_v22  ;;  %v328_v26 = vrot.slane %v327_v24, 4 }
  0x37   : > { %v323_v27 = vrot.slane %v322_v25, 2  ;;  %v329_v28 = vadd.f32 %v328_v26, %v327_v24 }
  0x39   : > { %v324_v29 = vadd.f32 %v323_v27, %v322_v25  ;;  %v330_v30 = vrot.slane %v329_v28, 2 }
  0x3b   : > { %v325_v31 = vrot.slane %v324_v29, 1  ;;  %v331_v32 = vadd.f32 %v330_v30, %v329_v28 }
  0x3d   : > { %v326_v33 = vadd.f32 %v325_v31, %v324_v29  ;;  %v332_v34 = vrot.slane %v331_v32, 1 }
  0x3f   : > { %v333_v35 = vadd.f32 %v332_v34, %v331_v32  ;;  %584 = vrcp.f32 %v326_v33 }
  0x41   : > { %586 = vrcp.f32 %v333_v35 }
  0x49   : > { %v585_v36 = vpop.eup %584 }
  0x4a   : > { %v336_v37 = vmul.f32 %v585_v36, %v326_v33 }
  0x4b   : > { %v587_v38 = vpop.eup %586 }
  0x4c   : > { %v337_v39 = vmul.f32 %v587_v38, %v333_v35  ;;  %v338_v40 = vsub.f32 2.0, %v336_v37 }
  0x4e   : > { %v339_v41 = vsub.f32 2.0, %v337_v39  ;;  %v340_v42 = vmul.f32 %v585_v36, %v338_v40 }
  0x50   : > { %v341_v43 = vmul.f32 %v587_v38, %v339_v41 }
  0x52   : > { %v344_v44 = vcombine.low %v340_v42, %v341_v43 }
  0x54   : > { %v346_v46 = vmul.f32 %v583_v20, %v344_v44 }
  0x56   : > { %v347_v48 = vmax.f32 %v346_v46, 1e-07 }
  0x58   : > { %v348_v49 = vmin.f32 %v347_v48, 0.9999999 }
  0x5a   : > { %v350_v50 = vmul.f32 %v348_v49, %v291_v47  ;;  %v375_v51 = vcombine.high %v348_v49, %v348_v49  ;;  %v377_v52 = vsel %vm295_vm1, %v348_v49, 0.0 }
  0x5c   : > { %v352_v54 = vcombine.high %v350_v50, %v350_v50  ;;  %v354_v55 = vsel %vm295_vm1, %v350_v50, 0.0  ;;  %v378_v56 = vsel %vm295_vm1, %v375_v51, 0.0 }
  0x5d   : > { %v379_v57 = vadd.f32 %v378_v56, %v377_v52 }
  0x5e   : > { %v355_v58 = vsel %vm295_vm1, %v352_v54, 0.0 }
  0x5f   : > { %v356_v61 = vadd.f32 %v355_v58, %v354_v55  ;;  %380 = vadd.xlane.f32.xlu1 %v379_v57 }
  0x61   : > { %357 = vadd.xlane.f32.xlu0 %v356_v61 }
  0x65   : > { %369 = vadd.xlane.f32.xlu0 %v368_v62 }
  0xec   : > { %v381_v1 = vpop.xlane.xlu1 %380 }
  0xed   : > { %v382_v2 = vadd.f32 %v381_v1, %v373_v63 }
  0xee   : > { %v358_v3 = vpop.xlane.xlu0 %357 }
  0xef   : > { %v359_v4 = vadd.f32 %v358_v3, %v349_v0  ;;  %383 = vst.msk [vmem:[#allocation4] sm:$0xf] %vm285_vm0, %v382_v2 }
  0xf1   : > { %361 = vst.msk [vmem:[#allocation2] sm:$0xf] %vm285_vm0, %v359_v4 }
  0xf2   : > { %v370_v6 = vpop.xlane.xlu0 %369 }
  0xf3   : > { %v371_v7 = vadd.f32 %v370_v6, %v362_v5 }
  0xf5   : > { %372 = vst.msk [vmem:[#allocation3] sm:$0xf] %vm285_vm0, %v371_v7 }
  0xf6   : > { %v391_v8 = vld [vmem:[#allocation4] sm:$0xf] }
  0xf7   : > { %392 = vst.msk [vmem:[%s280_s29] sm:$0xf] %vm285_vm0, %v391_v8 }
  0xf8   : > { %v387_v9 = vld [vmem:[#allocation2] sm:$0xf] }
  0xf9   : > { %388 = vst.msk [vmem:[%s272_s6] sm:$0xf] %vm285_vm0, %v387_v9 }
  0xfc   : > { %v389_v10 = vld [vmem:[#allocation3] sm:$0xf] }
  0xfd   : > { %390 = vst.msk [vmem:[%s276_s9] sm:$0xf] %vm285_vm0, %v389_v10 }
  0xfe PF: > { %s15_s17 = sadd.s32 1, %s610_s17   ;;  %s714_s15 = smov %s606_s16 }
  0xff   : > { %p12_p5 = scmp.ge.s32.totalorder %s15_s17, 4   ;;  %s715_s16 = smov %s717_s18 }
 0x101   :  { %14 = sbr.rel (!%p12_p5) target bundleno = 2 (0x2), region = 93 }

</bundles_post_ra>
